<compile_context>
chip_gen: v6e
topology: v6e:2x2x1
jax: 0.10.0
libtpu: 0.0.40
codegen_flags: <defaults>
</compile_context>

<pallas_src>
import functools
import math

import jax
import jax.numpy as jnp
from jax import lax
from jax.experimental import pallas as pl
from jax.experimental.pallas import tpu as pltpu


# ----------------------------------------------------------------------------
# Parameter / buffer construction (module __init__ equivalent)
# ----------------------------------------------------------------------------
def make_positional_encoding_table(max_len, d_model, dtype=jnp.float32):
    """pe[pos, 2i]   = sin(pos / 10000^(2i/d_model))
       pe[pos, 2i+1] = cos(pos / 10000^(2i/d_model))"""
    position = jnp.arange(max_len, dtype=jnp.float32)[:, None]            # (L, 1)
    div_term = jnp.exp(
        jnp.arange(0, d_model, 2, dtype=jnp.float32) * -(math.log(10000.0) / d_model)
    )                                                                     # (D/2,)
    pe = jnp.zeros((max_len, d_model), jnp.float32)
    pe = pe.at[:, 0::2].set(jnp.sin(position * div_term))
    pe = pe.at[:, 1::2].set(jnp.cos(position * div_term))
    return pe.astype(dtype)


# ----------------------------------------------------------------------------
# Stateless integer hash (lowbias32) -> uniform [0,1) per element.
# Pure int32 VPU ops; works on TPU and in interpret mode (unlike pltpu PRNG).
# ----------------------------------------------------------------------------
def _i32(v):
    v &= 0xFFFFFFFF
    return v - (1 << 32) if v >= (1 << 31) else v


_M1 = _i32(0x7FEB352D)
_M2 = _i32(0x846CA68B)
_GOLD = _i32(0x9E3779B1)


def _srl(x, n):
    # logical right shift for int32: arithmetic shift + mask off sign bits
    return (x >> n) & ((1 << (32 - n)) - 1)


def _mix_i32(x):
    x = x ^ _srl(x, 16)
    x = x * jnp.int32(_M1)
    x = x ^ _srl(x, 15)
    x = x * jnp.int32(_M2)
    x = x ^ _srl(x, 16)
    return x


# ----------------------------------------------------------------------------
# Pallas kernel: y = dropout(x + pe)
#   x_ref / o_ref : (TR, C) tile (batch dim squeezed)
#   pe_ref        : (TR, C) shared positional tile (same for every batch idx)
# ----------------------------------------------------------------------------
def _pe_dropout_kernel(seed_ref, x_ref, pe_ref, o_ref, *, p, training, n_rows_total):
    y = x_ref[...] + pe_ref[...]          # add in native dtype (bf16 ok on v6e/v7x)

    if training and p > 0.0:
        keep_prob = 1.0 - p
        tr, tc = x_ref.shape
        r = pl.program_id(0)              # row-tile index
        b = pl.program_id(1)              # batch index (innermost grid axis)

        rows = lax.broadcasted_iota(jnp.int32, (tr, tc), 0) + r * tr
        cols = lax.broadcasted_iota(jnp.int32, (tr, tc), 1)
        # global element id == b*S*D + s*D + d regardless of the lane-dense view
        idx = (b * jnp.int32(n_rows_total) + rows) * jnp.int32(tc) + cols

        k = _mix_i32(seed_ref[0] * jnp.int32(_GOLD) + jnp.int32(1))   # scalar mix
        h = _mix_i32(idx ^ k)                                         # per-element
        u = _srl(h, 8).astype(jnp.float32) * jnp.float32(1.0 / (1 << 24))  # [0,1)
        keep = u < jnp.float32(keep_prob)

        scale = jnp.asarray(1.0 / keep_prob, dtype=y.dtype)
        y = jnp.where(keep, y * scale, jnp.zeros_like(y))

    o_ref[...] = y.astype(o_ref.dtype)


# ----------------------------------------------------------------------------
# Wrapper
# ----------------------------------------------------------------------------
def positional_encoding_forward(x, pe_table, *, p=0.1, training=True, seed=0):
    """x: (B, S, D) float array; pe_table: (max_len, D)."""
    B, S, D = x.shape
    pe_slice = pe_table[:S].astype(x.dtype)   # like self.pe[:, :x.size(1)]
    itemsize = jnp.dtype(x.dtype).itemsize
    F = S * D

    if F % 128 == 0:
        # Lane-dense view: last dim is exactly 128 lanes -> unmasked stores.
        C = 128
        R = F // 128
        x2 = x.reshape(B, R, C)
        pe2 = pe_slice.reshape(R, C)
    else:
        # TODO(synk): lane-sparse fallback when S*D is not a multiple of 128
        # (correct, but stores are masked if D < 128).
        C = D
        R = S
        x2 = x
        pe2 = pe_slice

    # Row tile: sublane-aligned, ~1 MiB per buffer so double-buffered
    # in/out/pe fits VMEM on every generation (incl. v7x's 64 MiB).
    budget = 1 << 20
    max_rows = max(8, (budget // (C * itemsize)) // 8 * 8)
    TR = R if R <= max_rows else max_rows
    grid = (pl.cdiv(R, TR), B)   # batch innermost -> pe tile stays resident

    kernel = functools.partial(
        _pe_dropout_kernel, p=float(p), training=bool(training), n_rows_total=R
    )

    out2 = pl.pallas_call(
        kernel,
        out_shape=jax.ShapeDtypeStruct((B, R, C), x.dtype),
        grid_spec=pltpu.PrefetchScalarGridSpec(
            num_scalar_prefetch=1,       # seed lands in SMEM
            grid=grid,
            in_specs=[
                pl.BlockSpec((None, TR, C), lambda r, b, seed_sm: (b, r, 0)),
                pl.BlockSpec((TR, C), lambda r, b, seed_sm: (r, 0)),
            ],
            out_specs=pl.BlockSpec((None, TR, C), lambda r, b, seed_sm: (b, r, 0)),
        ),
        compiler_params=pltpu.CompilerParams(
            # stateless hash PRNG -> every grid step independent
            dimension_semantics=("parallel", "parallel"),
        ),
    )(jnp.asarray([seed], jnp.int32), x2, pe2)

    return out2.reshape(B, S, D)


# ----------------------------------------------------------------------------
if __name__ == "__main__":
    key = jax.random.PRNGKey(0)

    B, S, D = 2, 8, 32          # batch, seq, d_model
    MAX_LEN = 64
    P_DROP = 0.1

    x = jax.random.normal(key, (B, S, D), dtype=jnp.float32)
    pe_table = make_positional_encoding_table(MAX_LEN, D, dtype=jnp.float32)
    ref = x + pe_table[:S][None, :, :]

    # --- eval-mode check (dropout = identity): must equal x + pe ---
    y_eval = positional_encoding_forward(x, pe_table, p=P_DROP, training=False)
    y_eval = jax.block_until_ready(y_eval)
    assert jnp.allclose(y_eval, ref, atol=1e-6), "eval-mode mismatch vs reference"

    # --- training-mode run (inverted dropout via in-kernel hash PRNG) ---
    y_train = positional_encoding_forward(x, pe_table, p=P_DROP, training=True, seed=0)
    y_train = jax.block_until_ready(y_train)
    assert y_train.shape == (B, S, D)
    # surviving elements are scaled copies of the eval output
    surv = y_train != 0.0
    assert jnp.allclose(
        jnp.where(surv, y_train, 0.0),
        jnp.where(surv, ref / (1.0 - P_DROP), 0.0),
        atol=1e-5,
    ), "training-mode surviving elements mismatch"

    print("KERNEL_OK")
</pallas_src>

<mosaic_0001>
module attributes {stable_mosaic.version = 11 : i64} {
  func.func @_pe_dropout_kernel(%arg0: i32, %arg1: i32, %arg2: memref<1xi32, #tpu.memory_space<smem>>, %arg3: memref<1x2x128xf32, #tpu.memory_space<vmem>>, %arg4: memref<2x128xf32, #tpu.memory_space<vmem>>, %arg5: memref<1x2x128xf32, #tpu.memory_space<vmem>>) attributes {dimension_semantics = [#tpu.dimension_semantics<parallel>, #tpu.dimension_semantics<parallel>], iteration_bounds = array<i64: 1, 2>, scalar_prefetch = 1 : i64, scratch_operands = 0 : i64, tpu.core_type = #tpu.core_type<tc>, window_params = [{transform_indices = @transform_0, window_bounds = array<i64: 1, 2, 128>}, {transform_indices = @transform_1, window_bounds = array<i64: 2, 128>}, {transform_indices = @transform_2, window_bounds = array<i64: 1, 2, 128>}]} {
    %c0 = arith.constant 0 : index
    %c0_0 = arith.constant 0 : index
    %c0_1 = arith.constant 0 : index
    %0 = vector.load %arg3[%c0, %c0_0, %c0_1] : memref<1x2x128xf32, #tpu.memory_space<vmem>>, vector<1x2x128xf32>
    %1 = vector.shape_cast %0 : vector<1x2x128xf32> to vector<2x128xf32>
    %c0_2 = arith.constant 0 : index
    %c0_3 = arith.constant 0 : index
    %2 = vector.load %arg4[%c0_2, %c0_3] : memref<2x128xf32, #tpu.memory_space<vmem>>, vector<2x128xf32>
    %3 = arith.addf %1, %2 : vector<2x128xf32>
    %c0_4 = arith.constant 0 : index
    %c0_5 = arith.constant 0 : index
    %c0_6 = arith.constant 0 : index
    %4 = vector.load %arg5[%c0_4, %c0_5, %c0_6] : memref<1x2x128xf32, #tpu.memory_space<vmem>>, vector<1x2x128xf32>
    %5 = vector.shape_cast %4 : vector<1x2x128xf32> to vector<2x128xf32>
    %6 = vector.shape_cast %3 : vector<2x128xf32> to vector<1x2x128xf32>
    tpu.vector_store %arg5[%c0_4, %c0_5, %c0_6], %6 {strides = array<i32>} : memref<1x2x128xf32, #tpu.memory_space<vmem>>, vector<1x2x128xf32>,
    return
  }
  func.func @transform_0(%arg0: i32, %arg1: i32, %arg2: memref<1xi32, #tpu.memory_space<smem>>) -> (i32, i32, i32) {
    %c0_i32 = arith.constant 0 : i32
    %c0_i32_0 = arith.constant 0 : i32
    return %arg1, %arg0, %c0_i32 : i32, i32, i32
  }
  func.func @transform_1(%arg0: i32, %arg1: i32, %arg2: memref<1xi32, #tpu.memory_space<smem>>) -> (i32, i32) {
    %c0_i32 = arith.constant 0 : i32
    %c0_i32_0 = arith.constant 0 : i32
    return %arg0, %c0_i32 : i32, i32
  }
  func.func @transform_2(%arg0: i32, %arg1: i32, %arg2: memref<1xi32, #tpu.memory_space<smem>>) -> (i32, i32, i32) {
    %c0_i32 = arith.constant 0 : i32
    %c0_i32_0 = arith.constant 0 : i32
    return %arg1, %arg0, %c0_i32 : i32, i32, i32
  }
}

</mosaic_0001>

<bundles_post_ra>
// kernel: tpu_custom_call.1
= control target key start
LH: loop header
LB: loop body
LE: loop exit
PB: predicated region body
PF: predicated region fallthrough
CT: control target
= control target key end

     0   :  { %9 = vsyncpa [#allocation5], 0  ;;  %s654_s0 = inlined_call_operand.<no memory space> [shape: s32[1], index: 0, kind: input, shape index: {}]   ;;  %s655_s1 = inlined_call_operand.hbm [shape: f32[2,2,128], index: 1, kind: input, shape index: {}]   ;;  %s656_s2 = inlined_call_operand.vmem [shape: f32[2,128], index: 2, kind: input, shape index: {}]   ;;  %s657_s3 = inlined_call_operand.hbm [shape: f32[2,2,128], index: 3, kind: output, shape index: {}]  }
   0x1   :  { %11 = vsyncpa [#allocation5 + $0x1], 0 }
   0x2   :  { %12 = vsyncpa [#allocation6], 0 }
   0x3   :  { %14 = vsyncpa [#allocation6 + $0x1], 0  ;;  %s517_s12 = smov 0   ;;  %s519_s13 = smov 0  }
   0x4   :  { %s521_s14 = smov 0   ;;  %s523_s0 = smov 0  }
   0x5   :  { %s525_s15 = smov 0   ;;  %s527_s16 = smov 0  }
   0x6 LB: > { %s309_s17 = sadd.s32 4294967295, %s493_s16   ;;  %s310_s18 = sadd.s32 4294967294, %s493_s16   ;;  %s493_s16 = sphi %s527_s16, %s20_s16   ;;  %s489_s15 = sphi %s525_s15, %s669_s15   ;;  %s485_s0 = sphi %s523_s0, %s668_s0   ;;  %s481_s14 = sphi %s521_s14, %s667_s14   ;;  %s477_s13 = sphi %s519_s13, %s666_s13   ;;  %s473_s12 = sphi %s517_s12, %s665_s12  }
   0x7   : > { %s29_s19 = sadd.s32 1, %s489_s15  ;;  %s41_s20 = sadd.s32 1, %s481_s14 }
   0x8   : > { %p30_p0 = scmp.ge.s32.totalorder %s29_s19, 2  ;;  %p48_p1 = scmp.ne.s32.totalorder %s481_s14, %s477_s13 }
   0x9   : > { %p49_p2 = scmp.eq.s32.totalorder %s493_s16, 0  ;;  %p54_p3 = scmp.ne.s32.totalorder %s477_s13, %s473_s12 }
   0xa   : > { %s671_s19 = smov (%p30_p0, %s29_s19), 0  ;;  %p55_p5 = scmp.eq.s32.totalorder %s309_s17, 0 }
   0xb   : > { %p558_p4 = por %p49_p2, %p48_p1  ;;  %s36_s22 = ssub.s32 %s489_s15, %s671_s19 }
   0xc   : > { %p106_p6 = scmp.eq.s32.totalorder %s309_s17, 1  ;;  %p39_p7 = scmp.eq.s32.totalorder %s36_s22, 0 }
   0xd   : > { %p564_p8 = por %p55_p5, %p54_p3  ;;  %p112_p10 = scmp.eq.s32.totalorder %s310_s18, 1 }
   0xe   : > { %p568_p9 = por %p106_p6, %p48_p1  ;;  %p335_p13 = scmp.lt.s32.totalorder %s493_s16, 2 }
   0xf   : > { %s573_s25 = scalar_select %p39_p7, %s481_s14, %s41_s20  }
  0x10   : > { %p575_p11 = por %p112_p10, %p54_p3  ;;  %s139_s27 = sand.u32 1, %s481_s14  }
  0x11   : > { %s314_s28 = sshll.u32 %s139_s27, 1  ;;  %s315_s29 = sshll.u32 %s489_s15, 5 }
  0x12   : > { %s661_s26 = scalar_select %p575_p11, 1, 0 }
  0x13   : > { %s149_s5 = scalar_lea.hbm %s655_s1, %s315_s29  ;;  %s143_s6 = scalar_lea.vmem [#allocation4], %s314_s28 }
  0x14   : > { %s151_s7 = sshll.u32 %s143_s6, 4  ;;  %p588_p0 = pnand %p335_p13, %p558_p4  ;;  %s152_s7 = int_to_ptr.vmem [resolvable:$true] %s151_s7 }
  0x15   : > { %p316_p1 = scmp.ge.s32.totalorder %s493_s16, 1  ;;  %p156_p2 = scmp.lt.s32.totalorder %s493_s16, 3 }
  0x16   : > { %s140_s9 = scalar_lea.sflag [#allocation5], %s139_s27  ;;  %p387_p3 = pneg %p588_p0 }
  0x17   : > { %s398_s10 = scalar_lea.vmem %s152_s7, 32  ;;  %s495_s11 = smov [#allocation4]  }
  0x18   : > { %p399_p5 = scmp.ne.s32.totalorder %s152_s7, %s398_s10  ;;  %s403_s17 = sshll.u32 %s495_s11, 4  ;;  %s404_s17 = int_to_ptr.vmem [resolvable:$false] %s403_s17 }
  0x19   : > { %s405_s18 = scalar_lea.vmem %s404_s17, 64  ;;  %p406_p10 = scmp.lt.s32.totalorder %s152_s7, %s404_s17 }
  0x1a   : > { %p401_p6 = pnand %p399_p5, %p387_p3  ;;  %p407_p12 = scmp.lt.s32.totalorder %s405_s18, %s398_s10 }
  0x1c   : > { %p402_p7 = pneg %p401_p6  ;;  %p408_p4 = por %p407_p12, %p406_p10 }
  0x1e   : > { %p409_p13 = pnand %p408_p4, %p402_p7 }
  0x20   : > { %412 = shalt.err (!%p409_p13)
}
  0x21   : > { %330 = dma.hbm_to_vmem [thread:$0]  (!%p588_p0), %s149_s5, 32, %s152_s7, %s140_s9  }
  0x22   : > { %p157_p11 = pnand %p316_p1, %p156_p2 }
  0x23   : > { %s603_s20 = sand.u32 (!%p157_p11), 1, %s477_s13  }
  0x24   : > { %160 = sbr.rel (%p157_p11) target bundleno = 66 (0x42), region = 28  ;;  %s317_s21 = sshll.u32 (!%p157_p11), %s603_s20, 1 }
  0x25   : > { %s163_s22 = scalar_lea.sflag (!%p157_p11), [#allocation5], %s603_s20  ;;  %s166_s27 = scalar_lea.vmem (!%p157_p11), [#allocation4], %s317_s21 }
  0x29   : > { %464 = dma.done.wait (%p564_p8), %s163_s22, 32  }
  0x2a   : > { %466 = vsyncadd (%p564_p8), %s163_s22, 4294967264  ;;  %s190_s28 = scalar_lea.vmem [#allocation7], %s317_s21  ;;  %s320_s30 = sshll.u32 %s485_s0, 5  ;;  %v195_v0 = vld [vmem:[%s166_s27] sm:$0x3] }
  0x2b   : > { %s214_s29 = sshll.u32 %s190_s28, 4  ;;  %v196_v1 = vld [vmem:[%s656_s2] sm:$0x3]  ;;  %s212_s8 = scalar_lea.hbm %s657_s3, %s320_s30  ;;  %s215_s29 = int_to_ptr.vmem [resolvable:$true] %s214_s29 }
  0x2c   : > { %v197_v2 = vadd.f32 %v196_v1, %v195_v0  ;;  %s200_s23 = scalar_lea.sflag [#allocation6], %s603_s20  ;;  %s413_s9 = scalar_lea.vmem %s215_s29, 32 }
  0x2d   : > { %p414_p8 = scmp.ne.s32.totalorder %s215_s29, %s413_s9  ;;  %s496_s10 = smov [#allocation7]  }
  0x2e   : > { %198 = vst [vmem:[%s190_s28] sm:$0x3] %v197_v2  ;;  %s417_s0 = sshll.u32 %s496_s10, 4  ;;  %s418_s0 = int_to_ptr.vmem [resolvable:$false] %s417_s0 }
  0x2f   : > { %p415_p11 = pnand %p414_p8, %p568_p9  ;;  %s419_s11 = scalar_lea.vmem %s418_s0, 64 }
  0x30   : > { %p420_p0 = scmp.lt.s32.totalorder %s215_s29, %s418_s0  ;;  %p421_p1 = scmp.lt.s32.totalorder %s419_s11, %s413_s9 }
  0x31   : > { %p416_p12 = pneg %p415_p11 }
  0x32   : > { %p422_p2 = por %p421_p1, %p420_p0 }
  0x34   : > { %p423_p3 = pnand %p422_p2, %p416_p12 }
  0x36   : > { %426 = shalt.err (!%p423_p3)
}
  0x37   : > { %s427_s17 = scalar_lea.hbm %s212_s8, 32  ;;  %s431_s21 = scalar_lea.hbm %s657_s3, 64 }
  0x38   : > { %p428_p5 = scmp.ne.s32.totalorder %s212_s8, %s427_s17  ;;  %p432_p10 = scmp.lt.s32.totalorder %s212_s8, %s657_s3 }
  0x39   : > { %p433_p4 = scmp.lt.s32.totalorder %s431_s21, %s427_s17 }
  0x3a   : > { %p429_p6 = pnand %p428_p5, %p568_p9 }
  0x3b   : > { %p434_p13 = por %p433_p4, %p432_p10 }
  0x3c   : > { %p430_p7 = pneg %p429_p6 }
  0x3e   : > { %p435_p8 = pnand %p434_p13, %p430_p7 }
  0x40   : > { %438 = shalt.err (!%p435_p8)
}
  0x41   : > { %325 = dma.vmem_to_hbm [thread:$0]  (%p568_p9), %s215_s29, 32, %s212_s8, %s200_s23  }
  0x42 PF: > { %s226_s28 = sand.u32 1, %s473_s12   ;;  %p663_p11 = scmp.ne.s32.totalorder %s661_s26, 0 }
  0x43   : > { %p664_p12 = scmp.ge.s32.totalorder %s493_s16, 2  ;;  %s227_s30 = scalar_lea.sflag [#allocation6], %s226_s28 }
  0x45   : > { %p332_p0 = pnand %p664_p12, %p663_p11 }
  0x47   : > { %p333_p1 = pneg %p332_p0 }
  0x49   : > { %468 = dma.done.wait (%p333_p1), %s227_s30, 32  }
  0x4a   : > { %470 = vsyncadd (%p333_p1), %s227_s30, 4294967264  ;;  %s20_s16 = sadd.s32 1, %s493_s16   ;;  %s665_s12 = smov %s477_s13 }
  0x4b   : > { %p17_p2 = scmp.ge.s32.totalorder %s20_s16, 4   ;;  %s666_s13 = smov %s481_s14 }
  0x4c   : > { %s667_s14 = smov %s573_s25  ;;  %s668_s0 = smov %s489_s15 }
  0x4d   : > { %s669_s15 = smov %s671_s19  ;;  %19 = sbr.rel (!%p17_p2) target bundleno = 6 (0x6), region = 76 }
  0x52   :  { %232 = vsyncpa [#allocation5], 1 }
  0x53   :  { %234 = vsyncpa [#allocation5 + $0x1], 1 }
  0x54   :  { %235 = vsyncpa [#allocation6], 1 }
  0x55   :  { %237 = vsyncpa [#allocation6 + $0x1], 1 }

</bundles_post_ra>
